<compile_context>
chip_gen: v5e
topology: v5e:2x2
jax: 0.10.0
libtpu: 0.0.40
codegen_flags: <defaults>
</compile_context>

<pallas_src>
import jax
import jax.numpy as jnp
from jax.experimental import pallas as pl
from jax.experimental.pallas import tpu as pltpu


_LANES = 128  # last block dim an exact multiple of 128 -> unmasked vst stores


# --------------------------------------------------------------------------
# Production path: no kernel launch at all.
# --------------------------------------------------------------------------
def color_block_forward(z: jax.Array) -> jax.Array:
    """Zero-cost stand-in for ColorBlock.forward.

    TODO(synk): the reference forward() is `pass` (returns None); returning the
    input unchanged with no kernel launch is the chosen zero-cost substitution.
    Callers must not rely on receiving a fresh buffer.
    """
    return z


# --------------------------------------------------------------------------
# Optional Pallas realization (fusion anchor): pipelined identity copy.
# --------------------------------------------------------------------------
def _copy_kernel(z_ref, o_ref):
    # Pure pass-through of one VMEM tile.
    o_ref[...] = z_ref[...]


def _block_bytes_and_vmem_limit():
    """Generation-aware block size / scoped-VMEM limit (trace-time query)."""
    block_bytes = 4 * 1024 * 1024   # v5e/v6e: 4 MiB block x 2 ops x 2 bufs = 16 MiB
    vmem_limit = 32 * 1024 * 1024   # explicit limit keeps v5e (16 MiB default) safe
    try:
        info = pltpu.get_tpu_info()
        phys_vmem = getattr(info, "vmem_capacity_bytes", None)
        if phys_vmem is not None and phys_vmem <= 64 * 1024 * 1024:
            # v7x-class: 64 MiB VMEM but ~3.2 TB/s HBM -> bigger blocks pay off.
            block_bytes = 8 * 1024 * 1024
            vmem_limit = 40 * 1024 * 1024
    except Exception:
        pass
    return block_bytes, vmem_limit


@jax.jit
def color_block_identity_kernel(z: jax.Array) -> jax.Array:
    """Identity copy of `z` through VMEM, tiled and pipelined for all TPU gens."""
    orig_shape = z.shape
    n = z.size
    itemsize = jnp.dtype(z.dtype).itemsize
    block_bytes, vmem_limit = _block_bytes_and_vmem_limit()

    # Sublane alignment: 8 rows (32-bit), 16 (16-bit), 32 (8-bit packed).
    sub = 8 * max(1, 4 // itemsize)

    if n % _LANES == 0:
        # Fast path: lossless lane-dense (rows, 128) view — no pad, no slice.
        rows = n // _LANES
        z2d = z.reshape(rows, _LANES)
        trim = None
    else:
        # TODO(synk): rare ragged tail (< 128 elems); padded fallback costs one
        # extra pad + slice HBM pass.  NCHW activations here never hit this.
        rows = pl.cdiv(n, _LANES)
        z2d = jnp.pad(z.reshape(-1), (0, rows * _LANES - n)).reshape(rows, _LANES)
        trim = n

    if rows <= sub:
        tm = rows  # full-extent sublane dim (allowed even if not 8-aligned)
    else:
        max_rows = max(sub, (block_bytes // (_LANES * itemsize)) // sub * sub)
        tm = min(max_rows, pl.cdiv(rows, sub) * sub)
        # Keep both v7x TensorCores streaming: don't let a >=2 MiB slab
        # collapse to a length-1 grid.
        if tm >= rows and rows * _LANES * itemsize >= (1 << 21):
            tm = pl.cdiv(pl.cdiv(rows, 2), sub) * sub

    grid = (pl.cdiv(rows, tm),)  # ragged last block (if any) is masked by Pallas

    out2d = pl.pallas_call(
        _copy_kernel,
        out_shape=jax.ShapeDtypeStruct(z2d.shape, z2d.dtype),
        grid=grid,
        in_specs=[pl.BlockSpec((tm, _LANES), lambda i: (i, 0))],
        out_specs=pl.BlockSpec((tm, _LANES), lambda i: (i, 0)),
        compiler_params=pltpu.CompilerParams(
            dimension_semantics=("parallel",),  # shards the grid across v7x's 2 TCs
            vmem_limit_bytes=vmem_limit,
        ),
    )(z2d)

    if trim is None:
        return out2d.reshape(orig_shape)
    return out2d.reshape(-1)[:trim].reshape(orig_shape)


if __name__ == "__main__":
    key = jax.random.PRNGKey(0)
    # Small NCHW input consistent with a conv-style block: batch=2, C=4, 16x16.
    x = jax.random.normal(key, (2, 4, 16, 16), dtype=jnp.float32)

    # Zero-cost path (faithful to the empty forward, modulo "returns None").
    y_fast = color_block_forward(x)

    # Pallas kernel path (fusion-anchor identity copy) — runs on TPU.
    y_kern = jax.block_until_ready(color_block_identity_kernel(x))

    assert y_fast is x
    assert y_kern.shape == x.shape and y_kern.dtype == x.dtype
    assert jnp.allclose(y_kern, x)

    print("KERNEL_OK")
</pallas_src>

<mosaic_0001>
module attributes {stable_mosaic.version = 11 : i64} {
  func.func @_copy_kernel(%arg0: i32, %arg1: memref<16x128xf32, #tpu.memory_space<vmem>>, %arg2: memref<16x128xf32, #tpu.memory_space<vmem>>) attributes {dimension_semantics = [#tpu.dimension_semantics<parallel>], iteration_bounds = array<i64: 1>, scalar_prefetch = 0 : i64, scratch_operands = 0 : i64, tpu.core_type = #tpu.core_type<tc>, window_params = [{transform_indices = @transform_0, window_bounds = array<i64: 16, 128>}, {transform_indices = @transform_1, window_bounds = array<i64: 16, 128>}]} {
    %c0 = arith.constant 0 : index
    %c0_0 = arith.constant 0 : index
    %0 = vector.load %arg1[%c0, %c0_0] : memref<16x128xf32, #tpu.memory_space<vmem>>, vector<16x128xf32>
    %c0_1 = arith.constant 0 : index
    %c0_2 = arith.constant 0 : index
    %1 = vector.load %arg2[%c0_1, %c0_2] : memref<16x128xf32, #tpu.memory_space<vmem>>, vector<16x128xf32>
    tpu.vector_store %arg2[%c0_1, %c0_2], %0 {strides = array<i32>} : memref<16x128xf32, #tpu.memory_space<vmem>>, vector<16x128xf32>,
    return
  }
  func.func @transform_0(%arg0: i32) -> (i32, i32) {
    %c0_i32 = arith.constant 0 : i32
    %c0_i32_0 = arith.constant 0 : i32
    return %arg0, %c0_i32 : i32, i32
  }
  func.func @transform_1(%arg0: i32) -> (i32, i32) {
    %c0_i32 = arith.constant 0 : i32
    %c0_i32_0 = arith.constant 0 : i32
    return %arg0, %c0_i32 : i32, i32
  }
}

</mosaic_0001>

<bundles_post_ra>
// kernel: color_block_identity_kernel.1
= control target key start
LH: loop header
LB: loop body
LE: loop exit
PB: predicated region body
PF: predicated region fallthrough
CT: control target
= control target key end

     0   :  { %s38_s0 = inlined_call_operand.vmem [shape: f32[16,128], index: 0, kind: input, shape index: {}]   ;;  %s39_s1 = inlined_call_operand.vmem [shape: f32[16,128], index: 1, kind: output, shape index: {}]  }
   0x1   :  { %v8_v0 = vld [vmem:[%s38_s0] sm:$0xff]  ;;  %v9_v1 = vld [vmem:[%s38_s0 + $0x8] sm:$0xff] }
   0x2   :  { %10 = vst [vmem:[%s39_s1] sm:$0xff] %v8_v0 }
   0x3   :  { %11 = vst [vmem:[%s39_s1 + $0x8] sm:$0xff] %v9_v1 }

</bundles_post_ra>
